<compile_context>
chip_gen: v7x
topology: tpu7x:2x2x1
jax: 0.10.0
libtpu: 0.0.40
codegen_flags: <defaults>
</compile_context>

<pallas_src>
import functools

import numpy as np
import jax
import jax.numpy as jnp
from jax import lax
from jax.experimental import pallas as pl
from jax.experimental.pallas import tpu as pltpu

SENSITIVE_CLASSES = (0.0, 1.0)
Y_CLASSES = (0.0, 1.0)
N_CONSTRAINTS = len(SENSITIVE_CLASSES) * len(Y_CLASSES) * 2      # 8
DIM_CONDITION = len(Y_CLASSES) * (len(SENSITIVE_CLASSES) + 1)    # 6
N_GROUPS = 4                      # joint (sensitive, y) groups reduced in-kernel
LANES = 128
DEFAULT_MAX_BLOCK_ROWS = 2048     # multiple of 8 -> legal (8, 128) tiling


def _build_M():
    """Reproduces EqualiedOddsLoss.__init__ exactly (including the fact that
    __element_M is called with (a0, a1, y1, y1, s), i.e. y0 == y1 always)."""
    n_y = len(Y_CLASSES)
    M = np.zeros((N_CONSTRAINTS, DIM_CONDITION), dtype=np.float32)
    element_K_A = list(SENSITIVE_CLASSES) + [None]
    for i_a, a0 in enumerate(SENSITIVE_CLASSES):
        for i_y, _y0 in enumerate(Y_CLASSES):
            for i_s, s in enumerate([-1, 1]):
                for j_y, y1 in enumerate(Y_CLASSES):
                    for j_a, a1 in enumerate(element_K_A):
                        i = i_a * (2 * n_y) + i_y * 2 + i_s
                        j = j_y + n_y * j_a
                        if a0 is None or a1 is None:
                            val = -1.0 * s * float(y1 == y1)
                        else:
                            val = s * float((a0 == a1) and (y1 == y1))
                        M[i, j] = val
    return M


M_CONST = _build_M()  # (8, 6) constant constraint matrix; c == zeros(8)


def _eo_partial_kernel(logit_ref, sens_ref, y_ref, acc_ref, *,
                       bps, block_rows, n_valid, use_mask):
    """Grid = (split, bps): the outer axis is core-parallel, the inner axis
    streams this split's row blocks and accumulates into the resident output.

    acc_ref (output, (8, LANES) f32, resident across the inner axis):
      rows 0..3 : per-lane partial sums of sigmoid(logit) for the joint groups
                  (s==0,y==0), (s==0,y==1), (s==1,y==0), (s==1,y==1)
      rows 4..7 : per-lane partial element counts of the same groups
    """
    k = pl.program_id(1)

    @pl.when(k == 0)
    def _init():
        acc_ref[...] = jnp.zeros_like(acc_ref)

    # Cast in-kernel (inputs may arrive bf16 / int8); sigmoid runs on the EUP.
    p = jax.nn.sigmoid(logit_ref[...].astype(jnp.float32))   # (block_rows, LANES)
    sv = sens_ref[...]
    yv = y_ref[...]

    y0 = yv == 0
    y1 = yv == 1
    s0 = sv == 0
    s1 = sv == 1

    if use_mask:
        # Mask ragged tail / lane padding / (clamped) overshoot blocks by the
        # global element index.  int32 index -> supports n < 2**31.
        blk = pl.program_id(0) * bps + k
        base = blk * (block_rows * LANES)
        rid = lax.broadcasted_iota(jnp.int32, (block_rows, LANES), 0)
        lid = lax.broadcasted_iota(jnp.int32, (block_rows, LANES), 1)
        valid = (base + rid * LANES + lid) < n_valid
        s0 = s0 & valid
        s1 = s1 & valid

    masks = (s0 & y0, s0 & y1, s1 & y0, s1 & y1)
    parts = [jnp.sum(jnp.where(m, p, 0.0), axis=0, keepdims=True) for m in masks]
    parts += [jnp.sum(jnp.where(m, 1.0, 0.0), axis=0, keepdims=True) for m in masks]
    acc_ref[...] += jnp.concatenate(parts, axis=0)            # (8, LANES)


def equalized_odds_loss(X, out, sensitive, y, *, alpha=1.0,
                        max_block_rows=DEFAULT_MAX_BLOCK_ROWS):
    """Forward pass of EqualiedOddsLoss (value identical for both p_norm paths)."""
    del X  # unused by the loss, as in the PyTorch module
    assert max_block_rows >= 8 and max_block_rows % 8 == 0

    flat_p = out.reshape(-1)          # keep upstream dtypes; cast in-kernel
    flat_s = sensitive.reshape(-1)    # sensitive.view(out.shape)
    flat_y = y.reshape(-1)            # y.view(out.shape)
    n = flat_p.shape[0]

    rows = pl.cdiv(n, LANES)
    pad = rows * LANES - n
    if pad:  # tiny (<128 elem) pad only when the flat length is ragged
        flat_p = jnp.pad(flat_p, (0, pad))
        flat_s = jnp.pad(flat_s, (0, pad))
        flat_y = jnp.pad(flat_y, (0, pad))
    x2 = flat_p.reshape(rows, LANES)
    s2 = flat_s.reshape(rows, LANES)
    y2 = flat_y.reshape(rows, LANES)

    block_rows = rows if rows <= max_block_rows else max_block_rows
    num_blocks = pl.cdiv(rows, block_rows)
    split = 2 if num_blocks >= 2 else 1        # lets v7x shard across its 2 TCs
    bps = pl.cdiv(num_blocks, split)
    covered = split * bps * block_rows * LANES
    use_mask = covered != n

    if split * bps == num_blocks:
        def in_map(i, k):
            return (i * bps + k, 0)
    else:
        # Odd block count: the single overshoot block is clamped onto the last
        # real block; it is fully masked out in-kernel (global index >= n).
        def in_map(i, k):
            return (jnp.minimum(i * bps + k, num_blocks - 1), 0)

    kernel = functools.partial(_eo_partial_kernel, bps=bps, block_rows=block_rows,
                               n_valid=n, use_mask=use_mask)
    slab = pl.pallas_call(
        kernel,
        out_shape=jax.ShapeDtypeStruct((split * 2 * N_GROUPS, LANES), jnp.float32),
        grid=(split, bps),
        in_specs=[pl.BlockSpec((block_rows, LANES), in_map)] * 3,
        out_specs=pl.BlockSpec((2 * N_GROUPS, LANES), lambda i, k: (i, 0)),
        compiler_params=pltpu.CompilerParams(
            dimension_semantics=("parallel", "arbitrary")),
    )(x2, s2, y2)

    # Tiny epilogue in plain JAX: combine per-split / per-lane partials, build
    # mu in the exact order EqualiedOddsLoss.mu_f uses, then relu(M @ mu), dot.
    tot = jnp.sum(slab.reshape(split, 2 * N_GROUPS, LANES), axis=(0, 2))   # (8,)
    sums, cnts = tot[:N_GROUPS], tot[N_GROUPS:]
    mu = jnp.concatenate([
        sums / cnts,                                                   # joint (s,y) means
        jnp.stack([(sums[0] + sums[2]) / (cnts[0] + cnts[2]),          # mean over y==0
                   (sums[1] + sums[3]) / (cnts[1] + cnts[3])]),        # mean over y==1
    ])
    gap = jnp.maximum(jnp.asarray(M_CONST) @ mu, 0.0)                  # c == 0
    return jnp.float32(alpha) * jnp.dot(gap, gap)


def _reference(out, sensitive, y, alpha=1.0):
    """Pure-JAX mirror of the PyTorch forward, for correctness checking."""
    p = jax.nn.sigmoid(out.reshape(-1).astype(jnp.float32))
    sv = sensitive.reshape(-1).astype(jnp.float32)
    yv = y.reshape(-1).astype(jnp.float32)
    mu = []
    for u in SENSITIVE_CLASSES:
        for v in Y_CLASSES:
            m = ((yv == v) & (sv == u)).astype(jnp.float32)
            mu.append(jnp.sum(p * m) / jnp.sum(m))
    for v in Y_CLASSES:
        m = (yv == v).astype(jnp.float32)
        mu.append(jnp.sum(p * m) / jnp.sum(m))
    mu = jnp.stack(mu)
    gap = jnp.maximum(jnp.asarray(M_CONST) @ mu, 0.0)
    return alpha * jnp.dot(gap, gap)


if __name__ == "__main__":
    key = jax.random.PRNGKey(0)

    def run_case(n, max_block_rows, labels=None, key=key):
        k1, k2, k3, k4 = jax.random.split(key, 4)
        X = jax.random.normal(k1, (n, 4), dtype=jnp.float32)       # unused features
        logits = jax.random.normal(k2, (n, 1), dtype=jnp.float32)  # model output
        if labels is None:
            sens = jax.random.bernoulli(k3, 0.5, (n, 1)).astype(jnp.float32)
            yy = jax.random.bernoulli(k4, 0.5, (n, 1)).astype(jnp.float32)
        else:
            sens, yy = labels
        loss = jax.block_until_ready(
            equalized_odds_loss(X, logits, sens, yy, alpha=1.0,
                                max_block_rows=max_block_rows))
        ref = jax.block_until_ready(_reference(logits, sens, yy, alpha=1.0))
        assert abs(float(loss) - float(ref)) < 1e-5 + 1e-3 * abs(float(ref)), (
            n, max_block_rows, float(loss), float(ref))

    # 1) small, single full-array block, no masking path (n = 2048).
    run_case(2048, 2048)

    # 2) ragged length + multi-block + 2-way core split with an odd block count
    #    (exercises the pad, partial-block, clamp and validity-mask paths).
    run_case(2504, 8)

    # 3) tiny input: block == full array (rows not a multiple of 8), all four
    #    groups guaranteed non-empty by deterministic labels.
    n3 = 37
    idx = jnp.arange(n3)
    det_s = ((idx // 2) % 2).astype(jnp.float32).reshape(n3, 1)
    det_y = (idx % 2).astype(jnp.float32).reshape(n3, 1)
    run_case(n3, 2048, labels=(det_s, det_y))

    print("KERNEL_OK")
</pallas_src>

<mosaic_0001>
module attributes {stable_mosaic.version = 11 : i64} {
  func.func @_eo_partial_kernel(%arg0: i32, %arg1: i32, %arg2: memref<16x128xf32, #tpu.memory_space<vmem>>, %arg3: memref<16x128xf32, #tpu.memory_space<vmem>>, %arg4: memref<16x128xf32, #tpu.memory_space<vmem>>, %arg5: memref<8x128xf32, #tpu.memory_space<vmem>>) attributes {dimension_semantics = [#tpu.dimension_semantics<parallel>, #tpu.dimension_semantics<arbitrary>], iteration_bounds = array<i64: 1, 1>, scalar_prefetch = 0 : i64, scratch_operands = 0 : i64, tpu.core_type = #tpu.core_type<tc>, window_params = [{transform_indices = @transform_0, window_bounds = array<i64: 16, 128>}, {transform_indices = @transform_1, window_bounds = array<i64: 16, 128>}, {transform_indices = @transform_2, window_bounds = array<i64: 16, 128>}, {transform_indices = @transform_3, window_bounds = array<i64: 8, 128>}]} {
    %c0_i32 = arith.constant 0 : i32
    %0 = arith.cmpi eq, %arg1, %c0_i32 : i32
    %1 = arith.extui %0 : i1 to i32
    %c0_i32_0 = arith.constant 0 : i32
    %2 = arith.cmpi ne, %1, %c0_i32_0 : i32
    scf.if %2 {
      %cst_34 = arith.constant 0.000000e+00 : f32
      %63 = vector.broadcast %cst_34 : f32 to vector<8x128xf32>
      %c0_35 = arith.constant 0 : index
      %c0_36 = arith.constant 0 : index
      %64 = vector.load %arg5[%c0_35, %c0_36] : memref<8x128xf32, #tpu.memory_space<vmem>>, vector<8x128xf32>
      tpu.vector_store %arg5[%c0_35, %c0_36], %63 {strides = array<i32>} : memref<8x128xf32, #tpu.memory_space<vmem>>, vector<8x128xf32>,
    } else {
    }
    %c0 = arith.constant 0 : index
    %c0_1 = arith.constant 0 : index
    %3 = vector.load %arg2[%c0, %c0_1] : memref<16x128xf32, #tpu.memory_space<vmem>>, vector<16x128xf32>
    %4 = arith.negf %3 : vector<16x128xf32>
    %5 = math.exp %4 : vector<16x128xf32>
    %cst = arith.constant 1.000000e+00 : f32
    %6 = vector.broadcast %cst : f32 to vector<16x128xf32>
    %7 = arith.addf %6, %5 : vector<16x128xf32>
    %8 = arith.divf %6, %7 : vector<16x128xf32>
    %c0_2 = arith.constant 0 : index
    %c0_3 = arith.constant 0 : index
    %9 = vector.load %arg3[%c0_2, %c0_3] : memref<16x128xf32, #tpu.memory_space<vmem>>, vector<16x128xf32>
    %c0_4 = arith.constant 0 : index
    %c0_5 = arith.constant 0 : index
    %10 = vector.load %arg4[%c0_4, %c0_5] : memref<16x128xf32, #tpu.memory_space<vmem>>, vector<16x128xf32>
    %cst_6 = arith.constant 0.000000e+00 : f32
    %11 = vector.broadcast %cst_6 : f32 to vector<16x128xf32>
    %12 = arith.cmpf oeq, %10, %11 : vector<16x128xf32>
    %cst_7 = arith.constant 1.000000e+00 : f32
    %13 = vector.broadcast %cst_7 : f32 to vector<16x128xf32>
    %14 = arith.cmpf oeq, %10, %13 : vector<16x128xf32>
    %cst_8 = arith.constant 0.000000e+00 : f32
    %15 = vector.broadcast %cst_8 : f32 to vector<16x128xf32>
    %16 = arith.cmpf oeq, %9, %15 : vector<16x128xf32>
    %cst_9 = arith.constant 1.000000e+00 : f32
    %17 = vector.broadcast %cst_9 : f32 to vector<16x128xf32>
    %18 = arith.cmpf oeq, %9, %17 : vector<16x128xf32>
    %19 = arith.andi %16, %12 : vector<16x128xi1>
    %20 = arith.andi %16, %14 : vector<16x128xi1>
    %21 = arith.andi %18, %12 : vector<16x128xi1>
    %22 = arith.andi %18, %14 : vector<16x128xi1>
    %cst_10 = arith.constant 0.000000e+00 : f32
    %23 = vector.broadcast %cst_10 : f32 to vector<16x128xf32>
    %24 = arith.select %19, %8, %23 : vector<16x128xi1>, vector<16x128xf32>
    %cst_11 = arith.constant dense<0.000000e+00> : vector<128xf32>
    %25 = vector.multi_reduction <add>, %24, %cst_11 [0] : vector<16x128xf32> to vector<128xf32>
    %26 = vector.shape_cast %25 : vector<128xf32> to vector<1x128xf32>
    %cst_12 = arith.constant 0.000000e+00 : f32
    %27 = vector.broadcast %cst_12 : f32 to vector<16x128xf32>
    %28 = arith.select %20, %8, %27 : vector<16x128xi1>, vector<16x128xf32>
    %cst_13 = arith.constant dense<0.000000e+00> : vector<128xf32>
    %29 = vector.multi_reduction <add>, %28, %cst_13 [0] : vector<16x128xf32> to vector<128xf32>
    %30 = vector.shape_cast %29 : vector<128xf32> to vector<1x128xf32>
    %cst_14 = arith.constant 0.000000e+00 : f32
    %31 = vector.broadcast %cst_14 : f32 to vector<16x128xf32>
    %32 = arith.select %21, %8, %31 : vector<16x128xi1>, vector<16x128xf32>
    %cst_15 = arith.constant dense<0.000000e+00> : vector<128xf32>
    %33 = vector.multi_reduction <add>, %32, %cst_15 [0] : vector<16x128xf32> to vector<128xf32>
    %34 = vector.shape_cast %33 : vector<128xf32> to vector<1x128xf32>
    %cst_16 = arith.constant 0.000000e+00 : f32
    %35 = vector.broadcast %cst_16 : f32 to vector<16x128xf32>
    %36 = arith.select %22, %8, %35 : vector<16x128xi1>, vector<16x128xf32>
    %cst_17 = arith.constant dense<0.000000e+00> : vector<128xf32>
    %37 = vector.multi_reduction <add>, %36, %cst_17 [0] : vector<16x128xf32> to vector<128xf32>
    %38 = vector.shape_cast %37 : vector<128xf32> to vector<1x128xf32>
    %cst_18 = arith.constant 1.000000e+00 : f32
    %cst_19 = arith.constant 0.000000e+00 : f32
    %39 = vector.broadcast %cst_18 : f32 to vector<16x128xf32>
    %40 = vector.broadcast %cst_19 : f32 to vector<16x128xf32>
    %41 = arith.select %19, %39, %40 : vector<16x128xi1>, vector<16x128xf32>
    %cst_20 = arith.constant dense<0.000000e+00> : vector<128xf32>
    %42 = vector.multi_reduction <add>, %41, %cst_20 [0] : vector<16x128xf32> to vector<128xf32>
    %43 = vector.shape_cast %42 : vector<128xf32> to vector<1x128xf32>
    %cst_21 = arith.constant 1.000000e+00 : f32
    %cst_22 = arith.constant 0.000000e+00 : f32
    %44 = vector.broadcast %cst_21 : f32 to vector<16x128xf32>
    %45 = vector.broadcast %cst_22 : f32 to vector<16x128xf32>
    %46 = arith.select %20, %44, %45 : vector<16x128xi1>, vector<16x128xf32>
    %cst_23 = arith.constant dense<0.000000e+00> : vector<128xf32>
    %47 = vector.multi_reduction <add>, %46, %cst_23 [0] : vector<16x128xf32> to vector<128xf32>
    %48 = vector.shape_cast %47 : vector<128xf32> to vector<1x128xf32>
    %cst_24 = arith.constant 1.000000e+00 : f32
    %cst_25 = arith.constant 0.000000e+00 : f32
    %49 = vector.broadcast %cst_24 : f32 to vector<16x128xf32>
    %50 = vector.broadcast %cst_25 : f32 to vector<16x128xf32>
    %51 = arith.select %21, %49, %50 : vector<16x128xi1>, vector<16x128xf32>
    %cst_26 = arith.constant dense<0.000000e+00> : vector<128xf32>
    %52 = vector.multi_reduction <add>, %51, %cst_26 [0] : vector<16x128xf32> to vector<128xf32>
    %53 = vector.shape_cast %52 : vector<128xf32> to vector<1x128xf32>
    %cst_27 = arith.constant 1.000000e+00 : f32
    %cst_28 = arith.constant 0.000000e+00 : f32
    %54 = vector.broadcast %cst_27 : f32 to vector<16x128xf32>
    %55 = vector.broadcast %cst_28 : f32 to vector<16x128xf32>
    %56 = arith.select %22, %54, %55 : vector<16x128xi1>, vector<16x128xf32>
    %cst_29 = arith.constant dense<0.000000e+00> : vector<128xf32>
    %57 = vector.multi_reduction <add>, %56, %cst_29 [0] : vector<16x128xf32> to vector<128xf32>
    %58 = vector.shape_cast %57 : vector<128xf32> to vector<1x128xf32>
    %c0_30 = arith.constant 0 : index
    %c0_31 = arith.constant 0 : index
    %59 = vector.load %arg5[%c0_30, %c0_31] : memref<8x128xf32, #tpu.memory_space<vmem>>, vector<8x128xf32>
    %60 = tpu.concatenate %26, %30, %34, %38, %43, %48, %53, %58 in 0 : vector<1x128xf32>, vector<1x128xf32>, vector<1x128xf32>, vector<1x128xf32>, vector<1x128xf32>, vector<1x128xf32>, vector<1x128xf32>, vector<1x128xf32> -> vector<8x128xf32>
    %61 = arith.addf %59, %60 : vector<8x128xf32>
    %c0_32 = arith.constant 0 : index
    %c0_33 = arith.constant 0 : index
    %62 = vector.load %arg5[%c0_32, %c0_33] : memref<8x128xf32, #tpu.memory_space<vmem>>, vector<8x128xf32>
    tpu.vector_store %arg5[%c0_32, %c0_33], %61 {strides = array<i32>} : memref<8x128xf32, #tpu.memory_space<vmem>>, vector<8x128xf32>,
    return
  }
  func.func @transform_0(%arg0: i32, %arg1: i32) -> (i32, i32) {
    %c1_i32 = arith.constant 1 : i32
    %0 = arith.muli %arg0, %c1_i32 : i32
    %1 = arith.addi %0, %arg1 : i32
    %c0_i32 = arith.constant 0 : i32
    %c0_i32_0 = arith.constant 0 : i32
    return %1, %c0_i32 : i32, i32
  }
  func.func @transform_1(%arg0: i32, %arg1: i32) -> (i32, i32) {
    %c1_i32 = arith.constant 1 : i32
    %0 = arith.muli %arg0, %c1_i32 : i32
    %1 = arith.addi %0, %arg1 : i32
    %c0_i32 = arith.constant 0 : i32
    %c0_i32_0 = arith.constant 0 : i32
    return %1, %c0_i32 : i32, i32
  }
  func.func @transform_2(%arg0: i32, %arg1: i32) -> (i32, i32) {
    %c1_i32 = arith.constant 1 : i32
    %0 = arith.muli %arg0, %c1_i32 : i32
    %1 = arith.addi %0, %arg1 : i32
    %c0_i32 = arith.constant 0 : i32
    %c0_i32_0 = arith.constant 0 : i32
    return %1, %c0_i32 : i32, i32
  }
  func.func @transform_3(%arg0: i32, %arg1: i32) -> (i32, i32) {
    %c0_i32 = arith.constant 0 : i32
    %c0_i32_0 = arith.constant 0 : i32
    return %arg0, %c0_i32 : i32, i32
  }
}

</mosaic_0001>

<bundles_post_ra>
// kernel: tpu_custom_call.1
= control target key start
LH: loop header
LB: loop body
LE: loop exit
PB: predicated region body
PF: predicated region fallthrough
CT: control target
= control target key end

     0   :  { %8 = vsyncpa [#allocation3], 0  ;;  %s486_s0 = inlined_call_operand.hbm [shape: f32[16,128], index: 0, kind: input, shape index: {}]   ;;  %s487_s1 = inlined_call_operand.hbm [shape: f32[16,128], index: 1, kind: input, shape index: {}]   ;;  %s488_s2 = inlined_call_operand.hbm [shape: f32[16,128], index: 2, kind: input, shape index: {}]   ;;  %s489_s3 = inlined_call_operand.hbm [shape: f32[8,128], index: 3, kind: output, shape index: {}]  }
   0x1   :  { %9 = vsyncpa [#allocation6], 0 }
   0x2   :  { %10 = vsyncpa [#allocation4], 0  ;;  %s329_s12 = smov [#allocation5]   ;;  %s330_s14 = smov [#allocation2]  }
   0x3   :  { %s36_s13 = sshll.u32 %s329_s12, 4  ;;  %s20_s15 = sshll.u32 %s330_s14, 4  ;;  %s37_s13 = int_to_ptr.vmem [resolvable:$true] %s36_s13  ;;  %s356_s15 = int_to_ptr.vmem [resolvable:$true] %s20_s15 }
   0x4   :  { %s235_s18 = scalar_lea.hbm %s487_s1, 256 }
   0x5   :  { %p236_p0 = scmp.ne.s32.totalorder %s487_s1, %s235_s18  ;;  %p239_p1 = scmp.lt.u32.totalorder %s235_s18, %s487_s1 }
   0x7   :  { %p241_p2 = pnand %p239_p1, %p236_p0 }
   0x9   :  { %244 = shalt.err (!%p241_p2)
}
   0xa   :  { %s245_s23 = scalar_lea.vmem %s37_s13, 256  ;;  %p250_p4 = scmp.lt.s32.totalorder %s37_s13, %s37_s13 }
   0xb   :  { %p246_p3 = scmp.ne.s32.totalorder %s37_s13, %s245_s23  ;;  %p251_p5 = scmp.lt.s32.totalorder %s245_s23, %s245_s23 }
   0xd   :  { %p252_p6 = por %p251_p5, %p250_p4 }
   0xf   :  { %p253_p7 = pnand %p252_p6, %p246_p3 }
  0x11   :  { %256 = shalt.err (!%p253_p7)
}
  0x12   :  { %s331_s24 = smov 128   ;;  %s332_s25 = smov 8  }
  0x13   :  { %42 = dma.hbm_to_vmem [thread:$0]  %s487_s1, 256, %s37_s13, [#allocation6], %s331_s24, %s331_s24, %s332_s25  }
  0x14   :  { %s257_s30 = scalar_lea.hbm %s486_s0, 256 }
  0x15   :  { %p258_p8 = scmp.ne.s32.totalorder %s486_s0, %s257_s30  ;;  %p261_p9 = scmp.lt.u32.totalorder %s257_s30, %s486_s0 }
  0x17   :  { %p263_p10 = pnand %p261_p9, %p258_p8 }
  0x19   :  { %266 = shalt.err (!%p263_p10)
}
  0x1a   :  { %s267_s8 = scalar_lea.vmem %s356_s15, 256  ;;  %p272_p12 = scmp.lt.s32.totalorder %s356_s15, %s356_s15 }
  0x1b   :  { %p268_p11 = scmp.ne.s32.totalorder %s356_s15, %s267_s8  ;;  %p273_p13 = scmp.lt.s32.totalorder %s267_s8, %s267_s8 }
  0x1d   :  { %p274_p0 = por %p273_p13, %p272_p12 }
  0x1f   :  { %p275_p1 = pnand %p274_p0, %p268_p11 }
  0x21   :  { %278 = shalt.err (!%p275_p1)
}
  0x22   :  { %26 = dma.hbm_to_vmem [thread:$0]  %s486_s0, 256, %s356_s15, [#allocation3], %s331_s24, %s331_s24, %s332_s25  }
  0x23   :  { %s333_s10 = smov [#allocation7]   ;;  %s279_s14 = scalar_lea.hbm %s488_s2, 256 }
  0x24   :  { %s52_s11 = sshll.u32 %s333_s10, 4  ;;  %p280_p2 = scmp.ne.s32.totalorder %s488_s2, %s279_s14  ;;  %s53_s11 = int_to_ptr.vmem [resolvable:$true] %s52_s11 }
  0x25   :  { %p283_p3 = scmp.lt.u32.totalorder %s279_s14, %s488_s2 }
  0x27   :  { %p285_p4 = pnand %p283_p3, %p280_p2 }
  0x29   :  { %288 = shalt.err (!%p285_p4)
}
  0x2a   :  { %s289_s20 = scalar_lea.vmem %s53_s11, 256  ;;  %p294_p6 = scmp.lt.s32.totalorder %s53_s11, %s53_s11 }
  0x2b   :  { %p290_p5 = scmp.ne.s32.totalorder %s53_s11, %s289_s20  ;;  %p295_p7 = scmp.lt.s32.totalorder %s289_s20, %s289_s20 }
  0x2d   :  { %p296_p8 = por %p295_p7, %p294_p6 }
  0x2f   :  { %p297_p9 = pnand %p296_p8, %p290_p5 }
  0x31   :  { %300 = shalt.err (!%p297_p9)
}
  0x32   :  { %58 = dma.hbm_to_vmem [thread:$0]  %s488_s2, 256, %s53_s11, [#allocation6], %s331_s24, %s331_s24, %s332_s25  }
  0x33   :  { %323 = dma.done.wait [#allocation3], 256  }
  0x34   :  { %324 = vsyncadd [#allocation3], 4294967040 }
  0x35   :  { %325 = dma.done.wait [#allocation6], 512  }
  0x36   :  { %326 = vsyncadd [#allocation6], 4294966784  ;;  %v79_v0 = vld [vmem:[#allocation2] sm:$0xff]  ;;  %v80_v1 = vld [vmem:[#allocation2 + $0x8] sm:$0xff]  ;;  %v334_v16 = vmov 0.0   ;;  %s335_s2 = smov [#allocation8]  }
  0x37   :  { %v218_v2 = vmul.f32 -1.442695, %v79_v0  ;;  %v219_v3 = vmul.f32 -1.442695, %v80_v1  ;;  %v93_v4 = vld [vmem:[#allocation5] sm:$0xff]  ;;  %v95_v5 = vld [vmem:[#allocation7] sm:$0xff] }
  0x38   :  { %v94_v6 = vld [vmem:[#allocation5 + $0x8] sm:$0xff]  ;;  %v96_v7 = vld [vmem:[#allocation7 + $0x8] sm:$0xff]  ;;  %vm97_vm0 = vcmp.eq.f32.partialorder %v95_v5, 0.0  ;;  %vm101_vm1 = vcmp.eq.f32.partialorder %v93_v4, 0.0  ;;  %vm99_vm4 = vcmp.eq.f32.partialorder %v95_v5, 1.0  ;;  %vm103_vm7 = vcmp.eq.f32.partialorder %v93_v4, 1.0 }
  0x39   :  { %227 = vpow2.f32 %v218_v2  ;;  %vm98_vm2 = vcmp.eq.f32.partialorder %v96_v7, 0.0  ;;  %vm102_vm3 = vcmp.eq.f32.partialorder %v94_v6, 0.0  ;;  %vm100_vm5 = vcmp.eq.f32.partialorder %v96_v7, 1.0  ;;  %vm408_vm6 = vmand %vm101_vm1, %vm97_vm0  ;;  %s208_s21 = sshll.u32 %s335_s2, 4  ;;  %s209_s21 = int_to_ptr.vmem [resolvable:$true] %s208_s21 }
  0x3a   :  { %229 = vpow2.f32 %v219_v3  ;;  %vm412_vm8 = vmand %vm102_vm3, %vm98_vm2  ;;  %vm104_vm9 = vcmp.eq.f32.partialorder %v94_v6, 1.0  ;;  %v149_v17 = vsel %vm408_vm6, 1.0, %v334_v16  ;;  %s301_s22 = scalar_lea.vmem %s209_s21, 128  ;;  %p306_p11 = scmp.lt.s32.totalorder %s209_s21, %s209_s21 }
  0x3b   :  { %vm416_vm10 = vmand %vm101_vm1, %vm99_vm4  ;;  %v150_v18 = vsel %vm412_vm8, 1.0, %v334_v16  ;;  %vm188_vm1 = vcmask 1041408   ;;  %p302_p10 = scmp.ne.s32.totalorder %s209_s21, %s301_s22  ;;  %p307_p12 = scmp.lt.s32.totalorder %s301_s22, %s301_s22 }
  0x3c   :  { %vm421_vm11 = vmand %vm102_vm3, %vm100_vm5  ;;  %v158_v22 = vsel %vm416_vm10, 1.0, %v334_v16  ;;  %v151_v29 = vadd.f32 %v150_v18, %v149_v17  ;;  %vm192_vm3 = vcmask 1043456  }
  0x3d   :  { %vm425_vm12 = vmand %vm103_vm7, %vm97_vm0  ;;  %v159_v23 = vsel %vm421_vm11, 1.0, %v334_v16  ;;  %vm186_vm0 = vcmask 1040384   ;;  %p308_p13 = por %p307_p12, %p306_p11 }
  0x3e   :  { %vm429_vm13 = vmand %vm104_vm9, %vm98_vm2  ;;  %v167_v24 = vsel %vm425_vm12, 1.0, %v334_v16  ;;  %v160_v30 = vadd.f32 %v159_v23, %v158_v22  ;;  %v152_v33 = vrot.slane %v151_v29, 4  ;;  %vm190_vm2 = vcmask 1042432  }
  0x3f   :  { %vm433_vm14 = vmand %vm103_vm7, %vm99_vm4  ;;  %v168_v26 = vsel %vm429_vm13, 1.0, %v334_v16  ;;  %vm194_vm4 = vcmask 1044480   ;;  %p309_p0 = pnand %p308_p13, %p302_p10 }
  0x40   :  { %vm442_vm15 = vmand %vm104_vm9, %vm100_vm5  ;;  %v176_v27 = vsel %vm433_vm14, 1.0, %v334_v16  ;;  %v169_v31 = vadd.f32 %v168_v26, %v167_v24  ;;  %v161_v34 = vrot.slane %v160_v30, 4  ;;  %v153_v38 = vadd.f32 %v152_v33, %v151_v29 }
  0x41   :  { %v177_v28 = vsel %vm442_vm15, 1.0, %v334_v16  ;;  %vm196_vm5 = vcmask 1045504  }
  0x42   :  { %v178_v32 = vadd.f32 %v177_v28, %v176_v27  ;;  %v170_v35 = vrot.slane %v169_v31, 4  ;;  %v162_v39 = vadd.f32 %v161_v34, %v160_v30  ;;  %v154_v55 = vrot.slane %v153_v38, 2 }
  0x43   :  { %v228_v14 = vpop.eup %227 }
  0x44   :  { %v230_v19 = vpop.eup %229  ;;  %v87_v20 = vadd.f32 1.0, %v228_v14  ;;  %v179_v36 = vrot.slane %v178_v32, 4  ;;  %v171_v40 = vadd.f32 %v170_v35, %v169_v31  ;;  %v163_v56 = vrot.slane %v162_v39, 2 }
  0x45   :  { %v88_v25 = vadd.f32 1.0, %v230_v19  ;;  %v155_v3 = vadd.f32 %v154_v55, %v153_v38 }
  0x46   :  { %231 = vrcp.f32 %v87_v20  ;;  %v180_v41 = vadd.f32 %v179_v36, %v178_v32  ;;  %v172_v61 = vrot.slane %v171_v40, 2  ;;  %v164_v4 = vadd.f32 %v163_v56, %v162_v39 }
  0x47   :  { %233 = vrcp.f32 %v88_v25  ;;  %v156_v15 = vrot.slane %v155_v3, 1 }
  0x48   :  { %v181_v62 = vrot.slane %v180_v41, 2  ;;  %v173_v9 = vadd.f32 %v172_v61, %v171_v40  ;;  %v165_v16 = vrot.slane %v164_v4, 1 }
  0x49   :  { %v157_v27 = vadd.f32 %v156_v15, %v155_v3 }
  0x4a   :  { %v182_v10 = vadd.f32 %v181_v62, %v180_v41  ;;  %v174_v21 = vrot.slane %v173_v9, 1  ;;  %v166_v28 = vadd.f32 %v165_v16, %v164_v4 }
  0x4c   :  { %v183_v22 = vrot.slane %v182_v10, 1  ;;  %v175_v30 = vadd.f32 %v174_v21, %v173_v9 }
  0x4e   :  { %v184_v32 = vadd.f32 %v183_v22, %v182_v10 }
  0x50   :  { %v232_v37 = vpop.eup %231 }
  0x51   :  { %v234_v42 = vpop.eup %233  ;;  %v113_v43 = vsel %vm408_vm6, %v232_v37, 0.0  ;;  %v122_v44 = vsel %vm416_vm10, %v232_v37, 0.0  ;;  %v131_v45 = vsel %vm425_vm12, %v232_v37, 0.0  ;;  %v140_v46 = vsel %vm433_vm14, %v232_v37, 0.0 }
  0x52   :  { %v114_v47 = vsel %vm412_vm8, %v234_v42, 0.0  ;;  %v123_v48 = vsel %vm421_vm11, %v234_v42, 0.0  ;;  %v132_v49 = vsel %vm429_vm13, %v234_v42, 0.0  ;;  %v141_v50 = vsel %vm442_vm15, %v234_v42, 0.0 }
  0x53   :  { %v115_v51 = vadd.f32 %v114_v47, %v113_v43  ;;  %v124_v52 = vadd.f32 %v123_v48, %v122_v44  ;;  %v133_v53 = vadd.f32 %v132_v49, %v131_v45  ;;  %v142_v54 = vadd.f32 %v141_v50, %v140_v46 }
  0x54   :  { %vm198_vm6 = vcmask 1046528  }
  0x55   :  { %v116_v57 = vrot.slane %v115_v51, 4  ;;  %v125_v58 = vrot.slane %v124_v52, 4  ;;  %v134_v59 = vrot.slane %v133_v53, 4  ;;  %v143_v60 = vrot.slane %v142_v54, 4 }
  0x57   :  { %v117_v63 = vadd.f32 %v116_v57, %v115_v51  ;;  %v126_v0 = vadd.f32 %v125_v58, %v124_v52  ;;  %v135_v1 = vadd.f32 %v134_v59, %v133_v53  ;;  %v144_v2 = vadd.f32 %v143_v60, %v142_v54 }
  0x59   :  { %v118_v5 = vrot.slane %v117_v63, 2  ;;  %v127_v6 = vrot.slane %v126_v0, 2  ;;  %v136_v7 = vrot.slane %v135_v1, 2  ;;  %v145_v8 = vrot.slane %v144_v2, 2 }
  0x5b   :  { %v119_v11 = vadd.f32 %v118_v5, %v117_v63  ;;  %v128_v12 = vadd.f32 %v127_v6, %v126_v0  ;;  %v137_v13 = vadd.f32 %v136_v7, %v135_v1  ;;  %v146_v14 = vadd.f32 %v145_v8, %v144_v2 }
  0x5d   :  { %v120_v17 = vrot.slane %v119_v11, 1  ;;  %v129_v18 = vrot.slane %v128_v12, 1  ;;  %v138_v19 = vrot.slane %v137_v13, 1  ;;  %v147_v20 = vrot.slane %v146_v14, 1 }
  0x5f   :  { %v121_v23 = vadd.f32 %v120_v17, %v119_v11  ;;  %v130_v24 = vadd.f32 %v129_v18, %v128_v12  ;;  %v139_v25 = vadd.f32 %v138_v19, %v137_v13  ;;  %v148_v26 = vadd.f32 %v147_v20, %v146_v14 }
  0x61   :  { %v187_v29 = vsel %vm186_vm0, %v121_v23, %v130_v24 }
  0x62   :  { %v189_v31 = vsel %vm188_vm1, %v187_v29, %v139_v25 }
  0x63   :  { %v191_v33 = vsel %vm190_vm2, %v189_v31, %v148_v26 }
  0x64   :  { %v193_v34 = vsel %vm192_vm3, %v191_v33, %v157_v27 }
  0x65   :  { %v195_v35 = vsel %vm194_vm4, %v193_v34, %v166_v28 }
  0x66   :  { %v197_v36 = vsel %vm196_vm5, %v195_v35, %v175_v30 }
  0x67   :  { %v199_v37 = vsel %vm198_vm6, %v197_v36, %v184_v32 }
  0x68   :  { %201 = vst [vmem:[#allocation8] sm:$0xff] %v199_v37 }
  0x69   :  { %312 = shalt.err (!%p309_p0)
}
  0x6a   :  { %s313_s25 = scalar_lea.hbm %s489_s3, 128 }
  0x6b   :  { %p314_p1 = scmp.ne.s32.totalorder %s489_s3, %s313_s25  ;;  %p317_p2 = scmp.lt.u32.totalorder %s313_s25, %s489_s3 }
  0x6d   :  { %p319_p3 = pnand %p317_p2, %p314_p1 }
  0x6f   :  { %322 = shalt.err (!%p319_p3)
}
  0x70   :  { %211 = dma.vmem_to_hbm [thread:$0]  %s209_s21, 128, %s489_s3, [#allocation4]  }
  0x71   :  { %327 = dma.done.wait [#allocation4], 128  }
  0x72   :  { %328 = vsyncadd [#allocation4], 4294967168 }
  0x73   :  { %215 = vsyncpa [#allocation3], 1 }
  0x74   :  { %216 = vsyncpa [#allocation6], 1 }
  0x75   :  { %217 = vsyncpa [#allocation4], 1 }

</bundles_post_ra>
